<compile_context>
chip_gen: v7x
topology: tpu7x:2x2x1
jax: 0.10.0
libtpu: 0.0.40
codegen_flags: <defaults>
</compile_context>

<pallas_src>
import jax
import jax.numpy as jnp
from jax.experimental import pallas as pl
from jax.experimental.pallas import tpu as pltpu

LAYER_DIMS = [784, 200, 150, 100, 80, 10]


def _round_up(n, m):
    return ((n + m - 1) // m) * m


# Feature dims as seen inside the kernel:
#   * the input dim (784) is NOT padded: it already satisfies layout rules
#     (784 % 16 == 0) and padding to 896 costs extra MACs + an extra HBM pass.
#   * every *output* dim is zero-padded to a multiple of 128 so inter-layer
#     handoffs and the final store are lane-dense (no masked vst).
IN_DIMS = [784, 256, 256, 128, 128]    # per-layer (padded) input dims
OUT_DIMS = [256, 256, 128, 128, 128]   # per-layer (padded) output dims


def mlp_kernel(x_ref,
               w1_ref, b1_ref,
               w2_ref, b2_ref,
               w3_ref, b3_ref,
               w4_ref, b4_ref,
               w5_ref, b5_ref,
               o_ref):
    # Cast x f32 -> bf16 in-kernel (VPU work that hides under MXU/DMA slack).
    # Every matmul runs bf16 x bf16 -> f32 on the MXU; bias-add / ReLU are f32.
    h = x_ref[...].astype(jnp.bfloat16)                                 # (tb, 784)

    # Layer 1: Linear(784 -> 200) + ReLU   (Dropout == identity in eval)
    h = jnp.dot(h, w1_ref[...], preferred_element_type=jnp.float32) + b1_ref[...]
    h = jnp.maximum(h, 0.0)

    # Layer 2: Linear(200 -> 150) + ReLU
    h = jnp.dot(h.astype(jnp.bfloat16), w2_ref[...],
                preferred_element_type=jnp.float32) + b2_ref[...]
    h = jnp.maximum(h, 0.0)

    # Layer 3: Linear(150 -> 100) + ReLU
    h = jnp.dot(h.astype(jnp.bfloat16), w3_ref[...],
                preferred_element_type=jnp.float32) + b3_ref[...]
    h = jnp.maximum(h, 0.0)

    # Layer 4: Linear(100 -> 80) + ReLU
    h = jnp.dot(h.astype(jnp.bfloat16), w4_ref[...],
                preferred_element_type=jnp.float32) + b4_ref[...]
    h = jnp.maximum(h, 0.0)

    # Layer 5: Linear(80 -> 10), no activation. Real logits live in the first 10
    # columns; padded weight columns / bias entries are exact zeros.
    h = jnp.dot(h.astype(jnp.bfloat16), w5_ref[...],
                preferred_element_type=jnp.float32) + b5_ref[...]

    o_ref[...] = h.astype(o_ref.dtype)                                  # bf16 store


def pad_params(params):
    """Zero-pad (W [in,out], b [1,out]) to kernel shapes; W -> bf16, b -> f32."""
    padded = []
    for li, (w, b) in enumerate(params):
        din, dout = LAYER_DIMS[li], LAYER_DIMS[li + 1]
        dinp, doutp = IN_DIMS[li], OUT_DIMS[li]
        assert w.shape == (din, dout) and b.shape[-1] == dout
        w_p = jnp.zeros((dinp, doutp), jnp.bfloat16).at[:din, :dout].set(
            w.astype(jnp.bfloat16))
        b_p = jnp.zeros((1, doutp), jnp.float32).at[:, :dout].set(
            b.reshape(1, dout).astype(jnp.float32))
        padded.append((w_p, b_p))
    return padded


def _tensorcores_per_chip():
    """Best-effort detection of 2-TC (megacore-split-worthy) parts, i.e. v7x."""
    try:
        kind = jax.devices()[0].device_kind.lower()
        if "v7" in kind:
            return 2
    except Exception:
        pass
    return 1


def mlp_forward(x, params, *, tb=512):
    """x: [B, 784] float32. params: list of (W [in,out], b [1,out]). Returns [B, 10] f32."""
    B, D_in = x.shape
    assert D_in == LAYER_DIMS[0]
    D_out, D_out_pad = LAYER_DIMS[-1], OUT_DIMS[-1]

    # ---- choose the batch tile (multiple of 16 for bf16 sublane packing) -----
    tb = max(16, _round_up(tb, 16))
    tb = min(tb, _round_up(B, 16))
    # Only force >= 2 grid steps on 2-TensorCore parts (v7x megacore); on
    # v5e/v6e the grid is serial and splitting a single tile just adds overhead.
    if _tensorcores_per_chip() >= 2 and _round_up(B, tb) // tb < 2 and tb >= 32:
        tb = max(16, _round_up(tb // 2, 16))
    B_pad = _round_up(B, tb)

    # Pad the batch dim only if actually needed (no-op for aligned batches).
    if B_pad != B:
        x = jnp.pad(x, ((0, B_pad - B), (0, 0)))

    padded_params = pad_params(params)

    # x stays f32 in HBM; block (tb, 784) -- 784 equals the full array dim.
    in_specs = [pl.BlockSpec((tb, D_in), lambda i: (i, 0))]
    flat_params = []
    for (w, b) in padded_params:
        # Constant index_map: fetched once, revisited every grid step.
        in_specs.append(pl.BlockSpec(w.shape, lambda i: (0, 0)))
        in_specs.append(pl.BlockSpec(b.shape, lambda i: (0, 0)))
        flat_params.extend([w, b])

    out_specs = pl.BlockSpec((tb, D_out_pad), lambda i: (i, 0))

    # ---- cost estimate + VMEM sizing ----------------------------------------
    flops = 2 * B_pad * sum(IN_DIMS[i] * OUT_DIMS[i] for i in range(len(IN_DIMS)))
    param_bytes = sum(int(w.size) * w.dtype.itemsize + int(b.size) * b.dtype.itemsize
                      for (w, b) in padded_params)
    bytes_accessed = B_pad * D_in * 4 + param_bytes + B_pad * D_out_pad * 2
    cost = pl.CostEstimate(flops=flops, transcendentals=0,
                           bytes_accessed=bytes_accessed)

    vmem_need = (2 * tb * D_in * 4             # double-buffered f32 x tiles
                 + 2 * tb * D_out_pad * 2      # double-buffered bf16 out tiles
                 + 2 * param_bytes             # resident params (default 2 bufs)
                 + 4 * tb * max(OUT_DIMS) * 4)  # activation headroom
    # ~2x the computed need; never over-request (v7x scoped default is 32 MiB).
    vmem_limit = int(min(max(2 * vmem_need, 4 * 1024 * 1024), 32 * 1024 * 1024))

    out_padded = pl.pallas_call(
        mlp_kernel,
        out_shape=jax.ShapeDtypeStruct((B_pad, D_out_pad), jnp.bfloat16),
        grid_spec=pltpu.PrefetchScalarGridSpec(
            num_scalar_prefetch=0,
            grid=(B_pad // tb,),
            in_specs=in_specs,
            out_specs=out_specs,
        ),
        compiler_params=pltpu.CompilerParams(
            dimension_semantics=("parallel",),
            vmem_limit_bytes=vmem_limit),
        cost_estimate=cost,
    )(x, *flat_params)

    return out_padded[:B, :D_out].astype(jnp.float32)


def init_params(key):
    """Deterministic init matching PyTorch nn.Linear defaults: U(-k, k), k = 1/sqrt(fan_in)."""
    params = []
    for i in range(len(LAYER_DIMS) - 1):
        fan_in, fan_out = LAYER_DIMS[i], LAYER_DIMS[i + 1]
        key, kw, kb = jax.random.split(key, 3)
        bound = 1.0 / (fan_in ** 0.5)
        w = jax.random.uniform(kw, (fan_in, fan_out), jnp.float32, -bound, bound)
        b = jax.random.uniform(kb, (1, fan_out), jnp.float32, -bound, bound)
        params.append((w, b))
    return params


def mlp_reference(x, params):
    """Same numerics as the kernel: bf16 matmul operands, f32 accumulate / bias / ReLU."""
    h = x.astype(jnp.float32)
    for li, (w, b) in enumerate(params):
        h = jnp.dot(h.astype(jnp.bfloat16), w.astype(jnp.bfloat16),
                    preferred_element_type=jnp.float32) + b
        if li < len(params) - 1:
            h = jnp.maximum(h, 0.0)
    return h


if __name__ == "__main__":
    key = jax.random.PRNGKey(0)
    kx, kp = jax.random.split(key)

    B = 32  # small test batch (tile logic auto-adapts; large B uses tb=512 tiles)
    x = jax.random.normal(kx, (B, 784), dtype=jnp.float32)
    params = init_params(kp)

    out = mlp_forward(x, params)
    out = jax.block_until_ready(out)

    ref = mlp_reference(x, params)
    assert out.shape == (B, 10)
    # bf16 matmul operands + bf16 output store => tolerance ~1e-2 scale.
    assert jnp.allclose(out, ref, atol=2e-2, rtol=2e-2), "mismatch vs reference"

    print("KERNEL_OK")
</pallas_src>

<mosaic_0001>
module attributes {stable_mosaic.version = 11 : i64} {
  func.func @mlp_kernel(%arg0: i32, %arg1: memref<32x784xf32, #tpu.memory_space<vmem>>, %arg2: memref<784x256xbf16, #tpu.memory_space<vmem>>, %arg3: memref<1x256xf32, #tpu.memory_space<vmem>>, %arg4: memref<256x256xbf16, #tpu.memory_space<vmem>>, %arg5: memref<1x256xf32, #tpu.memory_space<vmem>>, %arg6: memref<256x128xbf16, #tpu.memory_space<vmem>>, %arg7: memref<1x128xf32, #tpu.memory_space<vmem>>, %arg8: memref<128x128xbf16, #tpu.memory_space<vmem>>, %arg9: memref<1x128xf32, #tpu.memory_space<vmem>>, %arg10: memref<128x128xbf16, #tpu.memory_space<vmem>>, %arg11: memref<1x128xf32, #tpu.memory_space<vmem>>, %arg12: memref<32x128xbf16, #tpu.memory_space<vmem>>) attributes {dimension_semantics = [#tpu.dimension_semantics<parallel>], iteration_bounds = array<i64: 1>, scalar_prefetch = 0 : i64, scratch_operands = 0 : i64, tpu.core_type = #tpu.core_type<tc>, window_params = [{transform_indices = @transform_0, window_bounds = array<i64: 32, 784>}, {pipeline_mode = #tpu.pipeline_mode<synchronous>, transform_indices = @transform_1, window_bounds = array<i64: 784, 256>}, {pipeline_mode = #tpu.pipeline_mode<synchronous>, transform_indices = @transform_2, window_bounds = array<i64: 1, 256>}, {pipeline_mode = #tpu.pipeline_mode<synchronous>, transform_indices = @transform_3, window_bounds = array<i64: 256, 256>}, {pipeline_mode = #tpu.pipeline_mode<synchronous>, transform_indices = @transform_4, window_bounds = array<i64: 1, 256>}, {pipeline_mode = #tpu.pipeline_mode<synchronous>, transform_indices = @transform_5, window_bounds = array<i64: 256, 128>}, {pipeline_mode = #tpu.pipeline_mode<synchronous>, transform_indices = @transform_6, window_bounds = array<i64: 1, 128>}, {pipeline_mode = #tpu.pipeline_mode<synchronous>, transform_indices = @transform_7, window_bounds = array<i64: 128, 128>}, {pipeline_mode = #tpu.pipeline_mode<synchronous>, transform_indices = @transform_8, window_bounds = array<i64: 1, 128>}, {pipeline_mode = #tpu.pipeline_mode<synchronous>, transform_indices = @transform_9, window_bounds = array<i64: 128, 128>}, {pipeline_mode = #tpu.pipeline_mode<synchronous>, transform_indices = @transform_10, window_bounds = array<i64: 1, 128>}, {transform_indices = @transform_11, window_bounds = array<i64: 32, 128>}]} {
    %c0 = arith.constant 0 : index
    %c0_0 = arith.constant 0 : index
    %0 = vector.load %arg1[%c0, %c0_0] : memref<32x784xf32, #tpu.memory_space<vmem>>, vector<32x784xf32>
    %1 = arith.truncf %0 : vector<32x784xf32> to vector<32x784xbf16>
    %c0_1 = arith.constant 0 : index
    %c0_2 = arith.constant 0 : index
    %2 = vector.load %arg2[%c0_1, %c0_2] : memref<784x256xbf16, #tpu.memory_space<vmem>>, vector<784x256xbf16>
    %cst = arith.constant dense<0.000000e+00> : vector<32x256xf32>
    %3 = tpu.matmul %1, %2, %cst {dimension_numbers = #tpu.dot_dimension_numbers<[1], [0], [0], [1], [0, 0, 1, 1], [], []>} : vector<32x784xbf16>, vector<784x256xbf16>, vector<32x256xf32> -> vector<32x256xf32>
    %c0_3 = arith.constant 0 : index
    %c0_4 = arith.constant 0 : index
    %4 = vector.load %arg3[%c0_3, %c0_4] : memref<1x256xf32, #tpu.memory_space<vmem>>, vector<1x256xf32>
    %5 = vector.broadcast %4 : vector<1x256xf32> to vector<32x256xf32>
    %6 = arith.addf %3, %5 : vector<32x256xf32>
    %cst_5 = arith.constant 0.000000e+00 : f32
    %7 = vector.broadcast %cst_5 : f32 to vector<32x256xf32>
    %8 = arith.maximumf %6, %7 : vector<32x256xf32>
    %9 = arith.truncf %8 : vector<32x256xf32> to vector<32x256xbf16>
    %c0_6 = arith.constant 0 : index
    %c0_7 = arith.constant 0 : index
    %10 = vector.load %arg4[%c0_6, %c0_7] : memref<256x256xbf16, #tpu.memory_space<vmem>>, vector<256x256xbf16>
    %cst_8 = arith.constant dense<0.000000e+00> : vector<32x256xf32>
    %11 = tpu.matmul %9, %10, %cst_8 {dimension_numbers = #tpu.dot_dimension_numbers<[1], [0], [0], [1], [0, 0, 1, 1], [], []>} : vector<32x256xbf16>, vector<256x256xbf16>, vector<32x256xf32> -> vector<32x256xf32>
    %c0_9 = arith.constant 0 : index
    %c0_10 = arith.constant 0 : index
    %12 = vector.load %arg5[%c0_9, %c0_10] : memref<1x256xf32, #tpu.memory_space<vmem>>, vector<1x256xf32>
    %13 = vector.broadcast %12 : vector<1x256xf32> to vector<32x256xf32>
    %14 = arith.addf %11, %13 : vector<32x256xf32>
    %cst_11 = arith.constant 0.000000e+00 : f32
    %15 = vector.broadcast %cst_11 : f32 to vector<32x256xf32>
    %16 = arith.maximumf %14, %15 : vector<32x256xf32>
    %17 = arith.truncf %16 : vector<32x256xf32> to vector<32x256xbf16>
    %c0_12 = arith.constant 0 : index
    %c0_13 = arith.constant 0 : index
    %18 = vector.load %arg6[%c0_12, %c0_13] : memref<256x128xbf16, #tpu.memory_space<vmem>>, vector<256x128xbf16>
    %cst_14 = arith.constant dense<0.000000e+00> : vector<32x128xf32>
    %19 = tpu.matmul %17, %18, %cst_14 {dimension_numbers = #tpu.dot_dimension_numbers<[1], [0], [0], [1], [0, 0, 1, 1], [], []>} : vector<32x256xbf16>, vector<256x128xbf16>, vector<32x128xf32> -> vector<32x128xf32>
    %c0_15 = arith.constant 0 : index
    %c0_16 = arith.constant 0 : index
    %20 = vector.load %arg7[%c0_15, %c0_16] : memref<1x128xf32, #tpu.memory_space<vmem>>, vector<1x128xf32>
    %21 = vector.broadcast %20 : vector<1x128xf32> to vector<32x128xf32>
    %22 = arith.addf %19, %21 : vector<32x128xf32>
    %cst_17 = arith.constant 0.000000e+00 : f32
    %23 = vector.broadcast %cst_17 : f32 to vector<32x128xf32>
    %24 = arith.maximumf %22, %23 : vector<32x128xf32>
    %25 = arith.truncf %24 : vector<32x128xf32> to vector<32x128xbf16>
    %c0_18 = arith.constant 0 : index
    %c0_19 = arith.constant 0 : index
    %26 = vector.load %arg8[%c0_18, %c0_19] : memref<128x128xbf16, #tpu.memory_space<vmem>>, vector<128x128xbf16>
    %cst_20 = arith.constant dense<0.000000e+00> : vector<32x128xf32>
    %27 = tpu.matmul %25, %26, %cst_20 {dimension_numbers = #tpu.dot_dimension_numbers<[1], [0], [0], [1], [0, 0, 1, 1], [], []>} : vector<32x128xbf16>, vector<128x128xbf16>, vector<32x128xf32> -> vector<32x128xf32>
    %c0_21 = arith.constant 0 : index
    %c0_22 = arith.constant 0 : index
    %28 = vector.load %arg9[%c0_21, %c0_22] : memref<1x128xf32, #tpu.memory_space<vmem>>, vector<1x128xf32>
    %29 = vector.broadcast %28 : vector<1x128xf32> to vector<32x128xf32>
    %30 = arith.addf %27, %29 : vector<32x128xf32>
    %cst_23 = arith.constant 0.000000e+00 : f32
    %31 = vector.broadcast %cst_23 : f32 to vector<32x128xf32>
    %32 = arith.maximumf %30, %31 : vector<32x128xf32>
    %33 = arith.truncf %32 : vector<32x128xf32> to vector<32x128xbf16>
    %c0_24 = arith.constant 0 : index
    %c0_25 = arith.constant 0 : index
    %34 = vector.load %arg10[%c0_24, %c0_25] : memref<128x128xbf16, #tpu.memory_space<vmem>>, vector<128x128xbf16>
    %cst_26 = arith.constant dense<0.000000e+00> : vector<32x128xf32>
    %35 = tpu.matmul %33, %34, %cst_26 {dimension_numbers = #tpu.dot_dimension_numbers<[1], [0], [0], [1], [0, 0, 1, 1], [], []>} : vector<32x128xbf16>, vector<128x128xbf16>, vector<32x128xf32> -> vector<32x128xf32>
    %c0_27 = arith.constant 0 : index
    %c0_28 = arith.constant 0 : index
    %36 = vector.load %arg11[%c0_27, %c0_28] : memref<1x128xf32, #tpu.memory_space<vmem>>, vector<1x128xf32>
    %37 = vector.broadcast %36 : vector<1x128xf32> to vector<32x128xf32>
    %38 = arith.addf %35, %37 : vector<32x128xf32>
    %39 = arith.truncf %38 : vector<32x128xf32> to vector<32x128xbf16>
    %c0_29 = arith.constant 0 : index
    %c0_30 = arith.constant 0 : index
    %40 = vector.load %arg12[%c0_29, %c0_30] : memref<32x128xbf16, #tpu.memory_space<vmem>>, vector<32x128xbf16>
    tpu.vector_store %arg12[%c0_29, %c0_30], %39 {strides = array<i32>} : memref<32x128xbf16, #tpu.memory_space<vmem>>, vector<32x128xbf16>,
    return
  }
  func.func @transform_0(%arg0: i32) -> (i32, i32) {
    %c0_i32 = arith.constant 0 : i32
    %c0_i32_0 = arith.constant 0 : i32
    return %arg0, %c0_i32 : i32, i32
  }
  func.func @transform_1(%arg0: i32) -> (i32, i32) {
    %c0_i32 = arith.constant 0 : i32
    %c0_i32_0 = arith.constant 0 : i32
    %c0_i32_1 = arith.constant 0 : i32
    return %c0_i32, %c0_i32_0 : i32, i32
  }
  func.func @transform_2(%arg0: i32) -> (i32, i32) {
    %c0_i32 = arith.constant 0 : i32
    %c0_i32_0 = arith.constant 0 : i32
    %c0_i32_1 = arith.constant 0 : i32
    return %c0_i32, %c0_i32_0 : i32, i32
  }
  func.func @transform_3(%arg0: i32) -> (i32, i32) {
    %c0_i32 = arith.constant 0 : i32
    %c0_i32_0 = arith.constant 0 : i32
    %c0_i32_1 = arith.constant 0 : i32
    return %c0_i32, %c0_i32_0 : i32, i32
  }
  func.func @transform_4(%arg0: i32) -> (i32, i32) {
    %c0_i32 = arith.constant 0 : i32
    %c0_i32_0 = arith.constant 0 : i32
    %c0_i32_1 = arith.constant 0 : i32
    return %c0_i32, %c0_i32_0 : i32, i32
  }
  func.func @transform_5(%arg0: i32) -> (i32, i32) {
    %c0_i32 = arith.constant 0 : i32
    %c0_i32_0 = arith.constant 0 : i32
    %c0_i32_1 = arith.constant 0 : i32
    return %c0_i32, %c0_i32_0 : i32, i32
  }
  func.func @transform_6(%arg0: i32) -> (i32, i32) {
    %c0_i32 = arith.constant 0 : i32
    %c0_i32_0 = arith.constant 0 : i32
    %c0_i32_1 = arith.constant 0 : i32
    return %c0_i32, %c0_i32_0 : i32, i32
  }
  func.func @transform_7(%arg0: i32) -> (i32, i32) {
    %c0_i32 = arith.constant 0 : i32
    %c0_i32_0 = arith.constant 0 : i32
    %c0_i32_1 = arith.constant 0 : i32
    return %c0_i32, %c0_i32_0 : i32, i32
  }
  func.func @transform_8(%arg0: i32) -> (i32, i32) {
    %c0_i32 = arith.constant 0 : i32
    %c0_i32_0 = arith.constant 0 : i32
    %c0_i32_1 = arith.constant 0 : i32
    return %c0_i32, %c0_i32_0 : i32, i32
  }
  func.func @transform_9(%arg0: i32) -> (i32, i32) {
    %c0_i32 = arith.constant 0 : i32
    %c0_i32_0 = arith.constant 0 : i32
    %c0_i32_1 = arith.constant 0 : i32
    return %c0_i32, %c0_i32_0 : i32, i32
  }
  func.func @transform_10(%arg0: i32) -> (i32, i32) {
    %c0_i32 = arith.constant 0 : i32
    %c0_i32_0 = arith.constant 0 : i32
    %c0_i32_1 = arith.constant 0 : i32
    return %c0_i32, %c0_i32_0 : i32, i32
  }
  func.func @transform_11(%arg0: i32) -> (i32, i32) {
    %c0_i32 = arith.constant 0 : i32
    %c0_i32_0 = arith.constant 0 : i32
    return %arg0, %c0_i32 : i32, i32
  }
}

</mosaic_0001>

<bundles_post_ra>
// kernel: tpu_custom_call.1
= control target key start
LH: loop header
LB: loop body
LE: loop exit
PB: predicated region body
PF: predicated region fallthrough
CT: control target
= control target key end

     0   :  { %16 = vsyncpa [#allocation3], 0  ;;  %s2656_s0 = inlined_call_operand.hbm [shape: f32[32,784], index: 0, kind: input, shape index: {}]   ;;  %s2657_s1 = inlined_call_operand.hbm [shape: bf16[784,256], index: 1, kind: input, shape index: {}]   ;;  %s2658_s2 = inlined_call_operand.vmem [shape: f32[1,256], index: 2, kind: input, shape index: {}]   ;;  %s2659_s3 = inlined_call_operand.hbm [shape: bf16[256,256], index: 3, kind: input, shape index: {}]   ;;  %s2660_s4 = inlined_call_operand.vmem [shape: f32[1,256], index: 4, kind: input, shape index: {}]   ;;  %s2661_s5 = inlined_call_operand.hbm [shape: bf16[256,128], index: 5, kind: input, shape index: {}]   ;;  %s2662_s6 = inlined_call_operand.vmem [shape: f32[1,128], index: 6, kind: input, shape index: {}]   ;;  %s2663_s7 = inlined_call_operand.hbm [shape: bf16[128,128], index: 7, kind: input, shape index: {}]   ;;  %s2664_s8 = inlined_call_operand.vmem [shape: f32[1,128], index: 8, kind: input, shape index: {}]   ;;  %s2665_s9 = inlined_call_operand.hbm [shape: bf16[128,128], index: 9, kind: input, shape index: {}]   ;;  %s2666_s10 = inlined_call_operand.vmem [shape: f32[1,128], index: 10, kind: input, shape index: {}]   ;;  %s2667_s11 = inlined_call_operand.hbm [shape: bf16[32,128], index: 11, kind: output, shape index: {}]  }
   0x1   :  { %17 = vsyncpa [#allocation6], 0 }
   0x2   :  { %18 = vsyncpa [#allocation9], 0 }
   0x3   :  { %19 = vsyncpa [#allocation12], 0 }
   0x4   :  { %20 = vsyncpa [#allocation4], 0  ;;  %s2451_s17 = smov [#allocation5]   ;;  %s2287_s21 = scalar_lea.hbm %s2657_s1, 12544 }
   0x5   :  { %s38_s18 = sshll.u32 %s2451_s17, 4  ;;  %p2288_p0 = scmp.ne.s32.totalorder %s2657_s1, %s2287_s21  ;;  %s39_s18 = int_to_ptr.vmem [resolvable:$true] %s38_s18 }
   0x6   :  { %p2291_p1 = scmp.lt.u32.totalorder %s2287_s21, %s2657_s1 }
   0x8   :  { %p2293_p2 = pnand %p2291_p1, %p2288_p0 }
   0xa   :  { %2296 = shalt.err (!%p2293_p2)
}
   0xb   :  { %s2297_s26 = scalar_lea.vmem %s39_s18, 12544  ;;  %p2302_p4 = scmp.lt.s32.totalorder %s39_s18, %s39_s18 }
   0xc   :  { %p2298_p3 = scmp.ne.s32.totalorder %s39_s18, %s2297_s26  ;;  %p2303_p5 = scmp.lt.s32.totalorder %s2297_s26, %s2297_s26 }
   0xe   :  { %p2304_p6 = por %p2303_p5, %p2302_p4 }
  0x10   :  { %p2305_p7 = pnand %p2304_p6, %p2298_p3 }
  0x12   :  { %2308 = shalt.err (!%p2305_p7)
}
  0x13   :  { %s2452_s27 = smov 128   ;;  %s2453_s28 = smov 8  }
  0x14   :  { %44 = dma.hbm_to_vmem [thread:$0]  %s2657_s1, 12544, %s39_s18, [#allocation6], %s2452_s27, %s2452_s27, %s2453_s28  }
  0x15   :  { %s2454_s12 = smov [#allocation8]   ;;  %s2309_s16 = scalar_lea.hbm %s2661_s5, 2048 }
  0x16   :  { %s66_s13 = sshll.u32 %s2454_s12, 4  ;;  %p2310_p8 = scmp.ne.s32.totalorder %s2661_s5, %s2309_s16  ;;  %s67_s13 = int_to_ptr.vmem [resolvable:$true] %s66_s13 }
  0x17   :  { %p2313_p9 = scmp.lt.u32.totalorder %s2309_s16, %s2661_s5 }
  0x19   :  { %p2315_p10 = pnand %p2313_p9, %p2310_p8 }
  0x1b   :  { %2318 = shalt.err (!%p2315_p10)
}
  0x1c   :  { %s2319_s22 = scalar_lea.vmem %s67_s13, 2048  ;;  %p2324_p12 = scmp.lt.s32.totalorder %s67_s13, %s67_s13 }
  0x1d   :  { %p2320_p11 = scmp.ne.s32.totalorder %s67_s13, %s2319_s22  ;;  %p2325_p13 = scmp.lt.s32.totalorder %s2319_s22, %s2319_s22 }
  0x1f   :  { %p2326_p0 = por %p2325_p13, %p2324_p12 }
  0x21   :  { %p2327_p1 = pnand %p2326_p0, %p2320_p11 }
  0x23   :  { %2330 = shalt.err (!%p2327_p1)
}
  0x24   :  { %s2455_s1 = smov 64   ;;  %s2456_s18 = smov 4  }
  0x25   :  { %72 = dma.hbm_to_vmem [thread:$0]  %s2661_s5, 2048, %s67_s13, [#allocation9], %s2455_s1, %s2455_s1, %s2456_s18  }
  0x26   :  { %s2457_s25 = smov [#allocation2]   ;;  %s2331_s12 = scalar_lea.hbm %s2656_s0, 3584 }
  0x27   :  { %s26_s26 = sshll.u32 %s2457_s25, 4  ;;  %p2332_p2 = scmp.ne.s32.totalorder %s2656_s0, %s2331_s12  ;;  %s27_s26 = int_to_ptr.vmem [resolvable:$true] %s26_s26 }
  0x28   :  { %p2335_p3 = scmp.lt.u32.totalorder %s2331_s12, %s2656_s0 }
  0x2a   :  { %p2337_p4 = pnand %p2335_p3, %p2332_p2 }
  0x2c   :  { %2340 = shalt.err (!%p2337_p4)
}
  0x2d   :  { %s2341_s19 = scalar_lea.vmem %s27_s26, 3584  ;;  %p2346_p6 = scmp.lt.s32.totalorder %s27_s26, %s27_s26 }
  0x2e   :  { %p2342_p5 = scmp.ne.s32.totalorder %s27_s26, %s2341_s19  ;;  %p2347_p7 = scmp.lt.s32.totalorder %s2341_s19, %s2341_s19 }
  0x30   :  { %p2348_p8 = por %p2347_p7, %p2346_p6 }
  0x32   :  { %p2349_p9 = pnand %p2348_p8, %p2342_p5 }
  0x34   :  { %2352 = shalt.err (!%p2349_p9)
}
  0x35   :  { %s2458_s5 = smov 896   ;;  %s2459_s13 = smov 56  }
  0x36   :  { %32 = dma.hbm_to_vmem [thread:$0]  %s2656_s0, 3584, %s27_s26, [#allocation3], %s2458_s5, %s2458_s5, %s2459_s13  }
  0x37   :  { %s2460_s22 = smov [#allocation7]   ;;  %s2461_s24 = smov [#allocation10]  }
  0x38   :  { %s52_s23 = sshll.u32 %s2460_s22, 4  ;;  %s80_s25 = sshll.u32 %s2461_s24, 4  ;;  %s53_s23 = int_to_ptr.vmem [resolvable:$true] %s52_s23  ;;  %s81_s25 = int_to_ptr.vmem [resolvable:$true] %s80_s25 }
  0x39   :  { %s2353_s12 = scalar_lea.hbm %s2659_s3, 4096 }
  0x3a   :  { %p2354_p10 = scmp.ne.s32.totalorder %s2659_s3, %s2353_s12  ;;  %p2357_p11 = scmp.lt.u32.totalorder %s2353_s12, %s2659_s3 }
  0x3c   :  { %p2359_p12 = pnand %p2357_p11, %p2354_p10 }
  0x3e   :  { %2362 = shalt.err (!%p2359_p12)
}
  0x3f   :  { %s2363_s0 = scalar_lea.vmem %s53_s23, 4096  ;;  %p2368_p0 = scmp.lt.s32.totalorder %s53_s23, %s53_s23 }
  0x40   :  { %p2364_p13 = scmp.ne.s32.totalorder %s53_s23, %s2363_s0  ;;  %p2369_p1 = scmp.lt.s32.totalorder %s2363_s0, %s2363_s0 }
  0x42   :  { %p2370_p2 = por %p2369_p1, %p2368_p0 }
  0x44   :  { %p2371_p3 = pnand %p2370_p2, %p2364_p13 }
  0x46   :  { %2374 = shalt.err (!%p2371_p3)
}
  0x47   :  { %58 = dma.hbm_to_vmem [thread:$0]  %s2659_s3, 4096, %s53_s23, [#allocation6], %s2452_s27, %s2452_s27, %s2453_s28  }
  0x48   :  { %s2375_s20 = scalar_lea.hbm %s2663_s7, 1024 }
  0x49   :  { %p2376_p4 = scmp.ne.s32.totalorder %s2663_s7, %s2375_s20  ;;  %p2379_p5 = scmp.lt.u32.totalorder %s2375_s20, %s2663_s7 }
  0x4b   :  { %p2381_p6 = pnand %p2379_p5, %p2376_p4 }
  0x4d   :  { %2384 = shalt.err (!%p2381_p6)
}
  0x4e   :  { %s2385_s30 = scalar_lea.vmem %s81_s25, 1024  ;;  %p2390_p8 = scmp.lt.s32.totalorder %s81_s25, %s81_s25 }
  0x4f   :  { %p2386_p7 = scmp.ne.s32.totalorder %s81_s25, %s2385_s30  ;;  %p2391_p9 = scmp.lt.s32.totalorder %s2385_s30, %s2385_s30 }
  0x51   :  { %p2392_p10 = por %p2391_p9, %p2390_p8 }
  0x53   :  { %p2393_p11 = pnand %p2392_p10, %p2386_p7 }
  0x55   :  { %2396 = shalt.err (!%p2393_p11)
}
  0x56   :  { %86 = dma.hbm_to_vmem [thread:$0]  %s2663_s7, 1024, %s81_s25, [#allocation9], %s2455_s1, %s2455_s1, %s2456_s18  }
  0x57   :  { %s2462_s28 = smov [#allocation11]   ;;  %s2397_s15 = scalar_lea.hbm %s2665_s9, 1024 }
  0x58   :  { %s94_s23 = sshll.u32 %s2462_s28, 4  ;;  %p2398_p12 = scmp.ne.s32.totalorder %s2665_s9, %s2397_s15  ;;  %s95_s23 = int_to_ptr.vmem [resolvable:$true] %s94_s23 }
  0x59   :  { %p2401_p13 = scmp.lt.u32.totalorder %s2397_s15, %s2665_s9 }
  0x5b   :  { %p2403_p0 = pnand %p2401_p13, %p2398_p12 }
  0x5d   :  { %2406 = shalt.err (!%p2403_p0)
}
  0x5e   :  { %s2407_s19 = scalar_lea.vmem %s95_s23, 1024  ;;  %p2412_p2 = scmp.lt.s32.totalorder %s95_s23, %s95_s23 }
  0x5f   :  { %p2408_p1 = scmp.ne.s32.totalorder %s95_s23, %s2407_s19  ;;  %p2413_p3 = scmp.lt.s32.totalorder %s2407_s19, %s2407_s19 }
  0x61   :  { %p2414_p4 = por %p2413_p3, %p2412_p2 }
  0x63   :  { %p2415_p5 = pnand %p2414_p4, %p2408_p1 }
  0x65   :  { %2418 = shalt.err (!%p2415_p5)
}
  0x66   :  { %100 = dma.hbm_to_vmem [thread:$0]  %s2665_s9, 1024, %s95_s23, [#allocation12], %s2455_s1, %s2455_s1, %s2456_s18  }
  0x67   :  { %2441 = dma.done.wait [#allocation3], 3584  }
  0x68   :  { %2442 = vsyncadd [#allocation3], 4294963712 }
  0x69   :  { %2443 = dma.done.wait [#allocation6], 16640  }
  0x6a   :  { %2444 = vsyncadd [#allocation6], 4294950656 }
  0x6b   :  { %2445 = dma.done.wait [#allocation9], 3072  }
  0x6c   :  { %2446 = vsyncadd [#allocation9], 4294964224 }
  0x6d   :  { %2447 = dma.done.wait [#allocation12], 1024  }
  0x6e   :  { %2448 = vsyncadd [#allocation12], 4294966272  ;;  %v2060_v0 = vld [vmem:[#allocation5 + $0x4] ss:$8 sps:$4 sm:$0xff]   ;;  %v2062_v1 = vld [vmem:[#allocation5] ss:$8 sps:$4 sm:$0xff]  }
  0x6f   :  { %771 = vmatprep.subr.bf16.mxu0 %v2060_v0  ;;  %v2063_v2 = vld [vmem:[#allocation5 + $0x14] ss:$8 sps:$4 sm:$0xff]   ;;  %v2065_v3 = vld [vmem:[#allocation5 + $0x10] ss:$8 sps:$4 sm:$0xff]   ;;  %v2066_v4 = vld [vmem:[#allocation5 + $0x24] ss:$8 sps:$4 sm:$0xff]  }
  0x70   :  { %772 = vmatpush1.bf16.msra.mxu0 %v2062_v1  ;;  %v2068_v5 = vld [vmem:[#allocation5 + $0x20] ss:$8 sps:$4 sm:$0xff]   ;;  %v2069_v6 = vld [vmem:[#allocation5 + $0x34] ss:$8 sps:$4 sm:$0xff]   ;;  %v2071_v7 = vld [vmem:[#allocation5 + $0x30] ss:$8 sps:$4 sm:$0xff]  }
  0x71   :  { %773 = vmatprep.subr.bf16.mxu0 %v2063_v2  ;;  %v2072_v8 = vld [vmem:[#allocation5 + $0x44] ss:$8 sps:$4 sm:$0xff]   ;;  %v2074_v9 = vld [vmem:[#allocation5 + $0x40] ss:$8 sps:$4 sm:$0xff]   ;;  %v2075_v10 = vld [vmem:[#allocation5 + $0x54] ss:$8 sps:$4 sm:$0xff]  }
  0x72   :  { %v2077_v11 = vld [vmem:[#allocation5 + $0x50] ss:$8 sps:$4 sm:$0xff]   ;;  %v2078_v12 = vld [vmem:[#allocation5 + $0x64] ss:$8 sps:$4 sm:$0xff]   ;;  %v2080_v16 = vld [vmem:[#allocation5 + $0x60] ss:$8 sps:$4 sm:$0xff]  }
  0x73   :  { %v123_v13 = vld [vmem:[#allocation2 + $0x8] sm:$0xff]  ;;  %v130_v14 = vld [vmem:[#allocation2 + $0x40] sm:$0xff]  ;;  %v2081_v17 = vld [vmem:[#allocation5 + $0x74] ss:$8 sps:$4 sm:$0xff]   ;;  %v2463_v44 = vmov 0   ;;  %vm764_vm0 = vcmask 130048  }
  0x74   :  { %774 = vmatpush1.bf16.msra.mxu0 %v2065_v3  ;;  %v151_v15 = vpack.c.bf16 %v130_v14, %v123_v13  ;;  %v2083_v18 = vld [vmem:[#allocation5 + $0x70] ss:$8 sps:$4 sm:$0xff]   ;;  %v2084_v19 = vld [vmem:[#allocation5 + $0x84] ss:$8 sps:$4 sm:$0xff]   ;;  %v2086_v20 = vld [vmem:[#allocation5 + $0x80] ss:$8 sps:$4 sm:$0xff]   ;;  %962 = vmatprep.mubr.bf16.mxu1 %v2463_v44 }
  0x75   :  { %775 = vmatprep.subr.bf16.mxu0 %v2066_v4  ;;  %v2087_v21 = vld [vmem:[#allocation5 + $0x94] ss:$8 sps:$4 sm:$0xff]   ;;  %v2089_v22 = vld [vmem:[#allocation5 + $0x90] ss:$8 sps:$4 sm:$0xff]   ;;  %v2090_v23 = vld [vmem:[#allocation5 + $0xa4] ss:$8 sps:$4 sm:$0xff]  }
  0x76   :  { %803 = vmatprep.mubr.bf16.mxu0 %v151_v15  ;;  %v2092_v24 = vld [vmem:[#allocation5 + $0xa0] ss:$8 sps:$4 sm:$0xff]   ;;  %v2093_v25 = vld [vmem:[#allocation5 + $0xb4] ss:$8 sps:$4 sm:$0xff]   ;;  %v2095_v26 = vld [vmem:[#allocation5 + $0xb0] ss:$8 sps:$4 sm:$0xff]  }
  0x77   :  { %v2096_v27 = vld [vmem:[#allocation5 + $0xc4] ss:$8 sps:$4 sm:$0xff]   ;;  %v2098_v28 = vld [vmem:[#allocation5 + $0xc0] ss:$8 sps:$4 sm:$0xff]   ;;  %v2099_v29 = vld [vmem:[#allocation5 + $0xd4] ss:$8 sps:$4 sm:$0xff]  }
  0x78   :  { %776 = vmatpush1.bf16.msra.mxu0 %v2068_v5  ;;  %v2101_v30 = vld [vmem:[#allocation5 + $0xd0] ss:$8 sps:$4 sm:$0xff]   ;;  %v2102_v31 = vld [vmem:[#allocation5 + $0xe4] ss:$8 sps:$4 sm:$0xff]   ;;  %v2104_v32 = vld [vmem:[#allocation5 + $0xe0] ss:$8 sps:$4 sm:$0xff]  }
  0x79   :  { %777 = vmatprep.subr.bf16.mxu0 %v2069_v6  ;;  %v2105_v33 = vld [vmem:[#allocation5 + $0xf4] ss:$8 sps:$4 sm:$0xff]   ;;  %v2107_v34 = vld [vmem:[#allocation5 + $0xf0] ss:$8 sps:$4 sm:$0xff]   ;;  %v2110_v35 = vld [vmem:[#allocation5 + $0x104] ss:$8 sps:$4 sm:$0xff]  }
  0x7a   :  { %v122_v36 = vld [vmem:[#allocation2] sm:$0xff]  ;;  %v129_v37 = vld [vmem:[#allocation2 + $0x38] sm:$0xff]  ;;  %v144_v39 = vld [vmem:[#allocation2 + $0xb0] sm:$0xff] }
  0x7b   :  { %v137_v38 = vld [vmem:[#allocation2 + $0x78] sm:$0xff]  ;;  %v150_v40 = vpack.c.bf16 %v129_v37, %v122_v36  ;;  %v2108_v41 = vld [vmem:[#allocation5 + $0x100] ss:$8 sps:$4 sm:$0xff]   ;;  %v2116_v46 = vld [vmem:[#allocation5 + $0x124] ss:$8 sps:$4 sm:$0xff]  }
  0x7c   :  { %778 = vmatpush1.bf16.msra.mxu0 %v2071_v7  ;;  %v158_v42 = vpack.c.bf16 %v144_v39, %v137_v38  ;;  %v2113_v43 = vld [vmem:[#allocation5 + $0x114] ss:$8 sps:$4 sm:$0xff]   ;;  %v2111_v45 = vld [vmem:[#allocation5 + $0x110] ss:$8 sps:$4 sm:$0xff]   ;;  %v143_v48 = vld [vmem:[#allocation2 + $0xa8] sm:$0xff] }
  0x7d   :  { %779 = vmatprep.subr.bf16.mxu0 %v2072_v8  ;;  %v136_v47 = vld [vmem:[#allocation2 + $0x70] sm:$0xff]  ;;  %v125_v49 = vld [vmem:[#allocation2 + $0x18] sm:$0xff]  ;;  %v2201_v51 = vld [vmem:[#allocation5 + $0x304] ss:$8 sps:$4 sm:$0xff]  }
  0x7e   :  { %v132_v50 = vld [vmem:[#allocation2 + $0x50] sm:$0xff]  ;;  %v157_v52 = vpack.c.bf16 %v143_v48, %v136_v47  ;;  %930 = vmatprep.subr.bf16.mxu1 %v2201_v51  ;;  %v2206_v53 = vld [vmem:[#allocation5 + $0x300] ss:$8 sps:$4 sm:$0xff]   ;;  %v2122_v61 = vld [vmem:[#allocation5 + $0x144] ss:$8 sps:$4 sm:$0xff]  }
  0x7f   :  { %v2114_v54 = vld [vmem:[#allocation5 + $0x120] ss:$8 sps:$4 sm:$0xff]   ;;  %v153_v55 = vpack.c.bf16 %v132_v50, %v125_v49  ;;  %v128_v56 = vld [vmem:[#allocation2 + $0x30] sm:$0xff]  ;;  %931 = vmatpush1.bf16.msra.mxu1 %v2206_v53  ;;  %v149_v1 = vld [vmem:[#allocation2 + $0xd8] sm:$0xff] }
  0x80   :  { %780 = vmatpush1.bf16.msra.mxu0 %v2074_v9  ;;  %v135_v57 = vld [vmem:[#allocation2 + $0x68] sm:$0xff]  ;;  %v2119_v58 = vld [vmem:[#allocation5 + $0x134] ss:$8 sps:$4 sm:$0xff]   ;;  %v2117_v60 = vld [vmem:[#allocation5 + $0x130] ss:$8 sps:$4 sm:$0xff]  }
  0x81   :  { %781 = vmatprep.subr.bf16.mxu0 %v2075_v10  ;;  %v156_v59 = vpack.c.bf16 %v135_v57, %v128_v56  ;;  %v142_v62 = vld [vmem:[#allocation2 + $0xa0] sm:$0xff]  ;;  %v2207_v63 = vld [vmem:[#allocation7] ss:$8 sps:$4 sm:$0xff]   ;;  %v2209_v0 = vld [vmem:[#allocation7 + $0x4] ss:$8 sps:$4 sm:$0xff]  }
  0x82   :  { %1199 = vmatprep.subr.bf16.mxu1 %v2209_v0  ;;  %v2212_v2 = vld [vmem:[#allocation7 + $0x14] ss:$8 sps:$4 sm:$0xff]   ;;  %v2210_v3 = vld [vmem:[#allocation7 + $0x10] ss:$8 sps:$4 sm:$0xff]   ;;  %v2215_v5 = vld [vmem:[#allocation7 + $0x24] ss:$8 sps:$4 sm:$0xff]   ;;  %v163_v7 = vpack.c.bf16 %v149_v1, %v142_v62 }
  0x83   :  { %1838 = vmatmul.mubr.msk.bf16.vlgmr.msra.gmra.mrb[0].mxu1 %vm764_vm0, %v156_v59  ;;  %v2120_v4 = vld [vmem:[#allocation5 + $0x140] ss:$8 sps:$4 sm:$0xff]   ;;  %v2125_v6 = vld [vmem:[#allocation5 + $0x154] ss:$8 sps:$4 sm:$0xff]   ;;  %v2213_v8 = vld [vmem:[#allocation7 + $0x20] ss:$8 sps:$4 sm:$0xff]  }
  0x84   :  { %782 = vmatpush1.bf16.msra.mxu0 %v2077_v11  ;;  %972 = vmatprep.mubr.bf16.mxu1 %v2463_v44  ;;  %v2123_v9 = vld [vmem:[#allocation5 + $0x150] ss:$8 sps:$4 sm:$0xff]   ;;  %v2218_v10 = vld [vmem:[#allocation7 + $0x34] ss:$8 sps:$4 sm:$0xff]   ;;  %v2126_v13 = vld [vmem:[#allocation5 + $0x160] ss:$8 sps:$4 sm:$0xff]  }
  0x85   :  { %783 = vmatprep.subr.bf16.mxu0 %v2078_v12  ;;  %1200 = vmatpush1.bf16.msra.mxu1 %v2207_v63  ;;  %v2128_v11 = vld [vmem:[#allocation5 + $0x164] ss:$8 sps:$4 sm:$0xff]   ;;  %v2216_v12 = vld [vmem:[#allocation7 + $0x30] ss:$8 sps:$4 sm:$0xff]   ;;  %v2221_v14 = vld [vmem:[#allocation7 + $0x44] ss:$8 sps:$4 sm:$0xff]  }
  0x86   :  { %1201 = vmatprep.subr.bf16.mxu1 %v2212_v2  ;;  %v2131_v15 = vld [vmem:[#allocation5 + $0x174] ss:$8 sps:$4 sm:$0xff]   ;;  %v2234_v36 = vld [vmem:[#allocation7 + $0x90] ss:$8 sps:$4 sm:$0xff]   ;;  %v2243_v48 = vld [vmem:[#allocation7 + $0xc0] ss:$8 sps:$4 sm:$0xff]  }
  0x87   :  { %v2144_v37 = vld [vmem:[#allocation5 + $0x1c0] ss:$8 sps:$4 sm:$0xff]   ;;  %v2239_v38 = vld [vmem:[#allocation7 + $0xa4] ss:$8 sps:$4 sm:$0xff]   ;;  %v2153_v49 = vld [vmem:[#allocation5 + $0x1f0] ss:$8 sps:$4 sm:$0xff]  }
  0x88   :  { %784 = vmatpush1.bf16.msra.mxu0 %v2080_v16  ;;  %v2129_v16 = vld [vmem:[#allocation5 + $0x170] ss:$8 sps:$4 sm:$0xff]   ;;  %v2149_v39 = vld [vmem:[#allocation5 + $0x1d4] ss:$8 sps:$4 sm:$0xff]   ;;  %v2240_v44 = vld [vmem:[#allocation7 + $0xb0] ss:$8 sps:$4 sm:$0xff]  }
  0x89   :  { %785 = vmatprep.subr.bf16.mxu0 %v2081_v17  ;;  %1202 = vmatpush1.bf16.msra.mxu1 %v2210_v3  ;;  %v2219_v17 = vld [vmem:[#allocation7 + $0x40] ss:$8 sps:$4 sm:$0xff]   ;;  %v2155_v47 = vld [vmem:[#allocation5 + $0x1f4] ss:$8 sps:$4 sm:$0xff]   ;;  %v131_v51 = vld [vmem:[#allocation2 + $0x48] sm:$0xff] }
  0x8a   :  { %1203 = vmatprep.subr.bf16.mxu1 %v2215_v5  ;;  %v124_v50 = vld [vmem:[#allocation2 + $0x10] sm:$0xff]  ;;  %v139_v53 = vld [vmem:[#allocation2 + $0x88] sm:$0xff]  ;;  %v134_v0 = vld [vmem:[#allocation2 + $0x60] sm:$0xff] }
  0x8b   :  { %1839 = vmatmul.mubr.msk.bf16.gmra.mrb[4].mxu1 %vm764_vm0, %v163_v7  ;;  %v2156_v56 = vld [vmem:[#allocation5 + $0x200] ss:$8 sps:$4 sm:$0xff]   ;;  %v2159_v59 = vld [vmem:[#allocation5 + $0x210] ss:$8 sps:$4 sm:$0xff]   ;;  %v2164_v62 = vld [vmem:[#allocation5 + $0x224] ss:$8 sps:$4 sm:$0xff]  }
  0x8c   :  { %786 = vmatpush1.bf16.msra.mxu0 %v2083_v18  ;;  %v2134_v18 = vld [vmem:[#allocation5 + $0x184] ss:$8 sps:$4 sm:$0xff]   ;;  %v2162_v2 = vld [vmem:[#allocation5 + $0x220] ss:$8 sps:$4 sm:$0xff]   ;;  %v2165_v5 = vld [vmem:[#allocation5 + $0x230] ss:$8 sps:$4 sm:$0xff]  }
  0x8d   :  { %787 = vmatprep.subr.bf16.mxu0 %v2084_v19  ;;  %1204 = vmatpush1.bf16.msra.mxu1 %v2213_v8  ;;  %v2224_v19 = vld [vmem:[#allocation7 + $0x54] ss:$8 sps:$4 sm:$0xff]   ;;  %v2168_v7 = vld [vmem:[#allocation5 + $0x240] ss:$8 sps:$4 sm:$0xff]   ;;  %v2173_v8 = vld [vmem:[#allocation5 + $0x254] ss:$8 sps:$4 sm:$0xff]  }
  0x8e   :  { %1205 = vmatprep.subr.bf16.mxu1 %v2218_v10  ;;  %v127_v63 = vld [vmem:[#allocation2 + $0x28] sm:$0xff] }
  0x8f   :  { %v155_v3 = vpack.c.bf16 %v134_v0, %v127_v63  ;;  %v2176_v10 = vld [vmem:[#allocation5 + $0x264] ss:$8 sps:$4 sm:$0xff]  }
  0x90   :  { %788 = vmatpush1.bf16.msra.mxu0 %v2086_v20  ;;  %v2222_v20 = vld [vmem:[#allocation7 + $0x50] ss:$8 sps:$4 sm:$0xff]  }
  0x91   :  { %789 = vmatprep.subr.bf16.mxu0 %v2087_v21  ;;  %1206 = vmatpush1.bf16.msra.mxu1 %v2216_v12  ;;  %v2132_v21 = vld [vmem:[#allocation5 + $0x180] ss:$8 sps:$4 sm:$0xff]   ;;  %v2179_v12 = vld [vmem:[#allocation5 + $0x274] ss:$8 sps:$4 sm:$0xff]  }
  0x92   :  { %1207 = vmatprep.subr.bf16.mxu1 %v2221_v14  ;;  %v2182_v14 = vld [vmem:[#allocation5 + $0x284] ss:$8 sps:$4 sm:$0xff]  }
  0x94   :  { %790 = vmatpush1.bf16.msra.mxu0 %v2089_v22  ;;  %v2227_v22 = vld [vmem:[#allocation7 + $0x64] ss:$8 sps:$4 sm:$0xff]  }
  0x95   :  { %791 = vmatprep.subr.bf16.mxu0 %v2090_v23  ;;  %v2137_v23 = vld [vmem:[#allocation5 + $0x194] ss:$8 sps:$4 sm:$0xff]   ;;  %1208 = vmatpush1.bf16.msra.mxu1 %v2219_v17  ;;  %v2183_v17 = vld [vmem:[#allocation5 + $0x290] ss:$8 sps:$4 sm:$0xff]  }
  0x96   :  { %1209 = vmatprep.subr.bf16.mxu1 %v2224_v19  ;;  %v2186_v19 = vld [vmem:[#allocation5 + $0x2a0] ss:$8 sps:$4 sm:$0xff]  }
  0x98   :  { %792 = vmatpush1.bf16.msra.mxu0 %v2092_v24  ;;  %v2225_v24 = vld [vmem:[#allocation7 + $0x60] ss:$8 sps:$4 sm:$0xff]  }
  0x99   :  { %793 = vmatprep.subr.bf16.mxu0 %v2093_v25  ;;  %v2135_v25 = vld [vmem:[#allocation5 + $0x190] ss:$8 sps:$4 sm:$0xff]   ;;  %1210 = vmatpush1.bf16.msra.mxu1 %v2222_v20  ;;  %v2191_v20 = vld [vmem:[#allocation5 + $0x2b4] ss:$8 sps:$4 sm:$0xff]  }
  0x9a   :  { %1211 = vmatprep.subr.bf16.mxu1 %v2227_v22  ;;  %v2194_v22 = vld [vmem:[#allocation5 + $0x2c4] ss:$8 sps:$4 sm:$0xff]  }
  0x9c   :  { %794 = vmatpush1.bf16.msra.mxu0 %v2095_v26  ;;  %v2230_v26 = vld [vmem:[#allocation7 + $0x74] ss:$8 sps:$4 sm:$0xff]  }
  0x9d   :  { %795 = vmatprep.subr.bf16.mxu0 %v2096_v27  ;;  %v2140_v27 = vld [vmem:[#allocation5 + $0x1a4] ss:$8 sps:$4 sm:$0xff]   ;;  %1212 = vmatpush1.bf16.msra.mxu1 %v2225_v24  ;;  %v2197_v24 = vld [vmem:[#allocation5 + $0x2d4] ss:$8 sps:$4 sm:$0xff]  }
  0x9e   :  { %1213 = vmatprep.subr.bf16.mxu1 %v2230_v26  ;;  %v2200_v26 = vld [vmem:[#allocation5 + $0x2e4] ss:$8 sps:$4 sm:$0xff]  }
  0xa0   :  { %796 = vmatpush1.bf16.msra.mxu0 %v2098_v28  ;;  %v2228_v28 = vld [vmem:[#allocation7 + $0x70] ss:$8 sps:$4 sm:$0xff]  }
  0xa1   :  { %797 = vmatprep.subr.bf16.mxu0 %v2099_v29  ;;  %v2138_v29 = vld [vmem:[#allocation5 + $0x1a0] ss:$8 sps:$4 sm:$0xff]   ;;  %1214 = vmatpush1.bf16.msra.mxu1 %v2228_v28  ;;  %v2205_v28 = vld [vmem:[#allocation5 + $0x2f4] ss:$8 sps:$4 sm:$0xff]  }
  0xa4   :  { %798 = vmatpush1.bf16.msra.mxu0 %v2101_v30  ;;  %v2233_v30 = vld [vmem:[#allocation7 + $0x84] ss:$8 sps:$4 sm:$0xff]  }
  0xa5   :  { %799 = vmatprep.subr.bf16.mxu0 %v2102_v31  ;;  %v2143_v31 = vld [vmem:[#allocation5 + $0x1b4] ss:$8 sps:$4 sm:$0xff]   ;;  %1215 = vmatprep.subr.bf16.mxu1 %v2233_v30  ;;  %v126_v30 = vld [vmem:[#allocation2 + $0x20] sm:$0xff] }
  0xa8   :  { %800 = vmatpush1.bf16.msra.mxu0 %v2104_v32  ;;  %v2231_v32 = vld [vmem:[#allocation7 + $0x80] ss:$8 sps:$4 sm:$0xff]  }
  0xa9   :  { %801 = vmatprep.subr.bf16.mxu0 %v2105_v33  ;;  %v2141_v33 = vld [vmem:[#allocation5 + $0x1b0] ss:$8 sps:$4 sm:$0xff]   ;;  %1216 = vmatpush1.bf16.msra.mxu1 %v2231_v32 }
  0xaa   :  { %v141_v32 = vld [vmem:[#allocation2 + $0x98] sm:$0xff] }
  0xac   :  { %802 = vmatpush1.bf16.msra.mxu0 %v2107_v34  ;;  %v2236_v34 = vld [vmem:[#allocation7 + $0x94] ss:$8 sps:$4 sm:$0xff]  }
  0xad   :  { %824 = vmatprep.subr.bf16.mxu0 %v2110_v35  ;;  %v2146_v35 = vld [vmem:[#allocation5 + $0x1c4] ss:$8 sps:$4 sm:$0xff]   ;;  %1217 = vmatprep.subr.bf16.mxu1 %v2236_v34 }
  0xae   :  { %1218 = vmatpush1.bf16.msra.mxu1 %v2234_v36  ;;  %v140_v36 = vld [vmem:[#allocation2 + $0x90] sm:$0xff] }
  0xaf   :  { %804 = vmatmul.mubr.bf16.vlgmr.msra.gmra.mrb[0].mxu0 %v150_v40  ;;  %v2237_v40 = vld [vmem:[#allocation7 + $0xa0] ss:$8 sps:$4 sm:$0xff]   ;;  %1219 = vmatprep.subr.bf16.mxu1 %v2239_v38 }
  0xb0   :  { %825 = vmatpush1.bf16.msra.mxu0 %v2108_v41  ;;  %813 = vmatprep.mubr.bf16.mxu0 %v158_v42  ;;  %v2147_v41 = vld [vmem:[#allocation5 + $0x1d0] ss:$8 sps:$4 sm:$0xff]   ;;  %v2242_v42 = vld [vmem:[#allocation7 + $0xb4] ss:$8 sps:$4 sm:$0xff]  }
  0xb1   :  { %826 = vmatprep.subr.bf16.mxu0 %v2113_v43  ;;  %v2152_v43 = vld [vmem:[#allocation5 + $0x1e4] ss:$8 sps:$4 sm:$0xff]  }
  0xb2   :  { %1220 = vmatpush1.bf16.msra.mxu1 %v2237_v40  ;;  %v2246_v40 = vld [vmem:[#allocation7 + $0xd0] ss:$8 sps:$4 sm:$0xff]  }
  0xb3   :  { %1221 = vmatprep.subr.bf16.mxu1 %v2242_v42  ;;  %v2249_v42 = vld [vmem:[#allocation7 + $0xe0] ss:$8 sps:$4 sm:$0xff]  }
  0xb4   :  { %827 = vmatpush1.bf16.msra.mxu0 %v2111_v45  ;;  %v2150_v45 = vld [vmem:[#allocation5 + $0x1e0] ss:$8 sps:$4 sm:$0xff]  }
  0xb5   :  { %828 = vmatprep.subr.bf16.mxu0 %v2116_v46  ;;  %v2245_v46 = vld [vmem:[#allocation7 + $0xc4] ss:$8 sps:$4 sm:$0xff]  }
  0xb6   :  { %1222 = vmatpush1.bf16.msra.mxu1 %v2240_v44  ;;  %v2252_v44 = vld [vmem:[#allocation7 + $0xf0] ss:$8 sps:$4 sm:$0xff]  }
  0xb7   :  { %814 = vmatmul.mubr.bf16.gmra.mrb[4].mxu0 %v157_v52  ;;  %1223 = vmatprep.subr.bf16.mxu1 %v2245_v46  ;;  %v2158_v52 = vld [vmem:[#allocation5 + $0x204] ss:$8 sps:$4 sm:$0xff]  }
  0xb8   :  { %829 = vmatpush1.bf16.msra.mxu0 %v2114_v54  ;;  %856 = vmatprep.mubr.bf16.mxu0 %v153_v55  ;;  %v146_v54 = vld [vmem:[#allocation2 + $0xc0] sm:$0xff]  ;;  %v152_v55 = vpack.c.bf16 %v131_v51, %v124_v50 }
  0xb9   :  { %830 = vmatprep.subr.bf16.mxu0 %v2119_v58  ;;  %v160_v57 = vpack.c.bf16 %v146_v54, %v139_v53  ;;  %v2161_v58 = vld [vmem:[#allocation5 + $0x214] ss:$8 sps:$4 sm:$0xff]   ;;  %v264_v54 = vlaneseq }
  0xba   :  { %1224 = vmatpush1.bf16.msra.mxu1 %v2243_v48  ;;  %v2255_v53 = vld [vmem:[#allocation8 + $0x40] sm:$0xff]  }
  0xbc   :  { %831 = vmatpush1.bf16.msra.mxu0 %v2117_v60  ;;  %v138_v60 = vld [vmem:[#allocation2 + $0x80] sm:$0xff] }
  0xbd   :  { %832 = vmatprep.subr.bf16.mxu0 %v2122_v61  ;;  %v145_v61 = vld [vmem:[#allocation2 + $0xb8] sm:$0xff] }
  0xbe   :  { %v159_v1 = vpack.c.bf16 %v145_v61, %v138_v60 }
  0xc0   :  { %833 = vmatpush1.bf16.msra.mxu0 %v2120_v4  ;;  %v2167_v4 = vld [vmem:[#allocation5 + $0x234] ss:$8 sps:$4 sm:$0xff]  }
  0xc1   :  { %834 = vmatprep.subr.bf16.mxu0 %v2125_v6  ;;  %v2170_v6 = vld [vmem:[#allocation5 + $0x244] ss:$8 sps:$4 sm:$0xff]  }
  0xc4   :  { %835 = vmatpush1.bf16.msra.mxu0 %v2123_v9  ;;  %v2171_v9 = vld [vmem:[#allocation5 + $0x250] ss:$8 sps:$4 sm:$0xff]  }
  0xc5   :  { %836 = vmatprep.subr.bf16.mxu0 %v2128_v11  ;;  %v2174_v11 = vld [vmem:[#allocation5 + $0x260] ss:$8 sps:$4 sm:$0xff]  }
  0xc8   :  { %837 = vmatpush1.bf16.msra.mxu0 %v2126_v13  ;;  %v2177_v13 = vld [vmem:[#allocation5 + $0x270] ss:$8 sps:$4 sm:$0xff]  }
  0xc9   :  { %838 = vmatprep.subr.bf16.mxu0 %v2131_v15  ;;  %v2180_v15 = vld [vmem:[#allocation5 + $0x280] ss:$8 sps:$4 sm:$0xff]  }
  0xcc   :  { %839 = vmatpush1.bf16.msra.mxu0 %v2129_v16  ;;  %v2185_v16 = vld [vmem:[#allocation5 + $0x294] ss:$8 sps:$4 sm:$0xff]  }
  0xcd   :  { %840 = vmatprep.subr.bf16.mxu0 %v2134_v18  ;;  %v2188_v18 = vld [vmem:[#allocation5 + $0x2a4] ss:$8 sps:$4 sm:$0xff]  }
  0xd0   :  { %841 = vmatpush1.bf16.msra.mxu0 %v2132_v21  ;;  %v2189_v21 = vld [vmem:[#allocation5 + $0x2b0] ss:$8 sps:$4 sm:$0xff]  }
  0xd1   :  { %842 = vmatprep.subr.bf16.mxu0 %v2137_v23  ;;  %v2192_v23 = vld [vmem:[#allocation5 + $0x2c0] ss:$8 sps:$4 sm:$0xff]  }
  0xd4   :  { %843 = vmatpush1.bf16.msra.mxu0 %v2135_v25  ;;  %v2195_v25 = vld [vmem:[#allocation5 + $0x2d0] ss:$8 sps:$4 sm:$0xff]  }
  0xd5   :  { %844 = vmatprep.subr.bf16.mxu0 %v2140_v27  ;;  %v2198_v27 = vld [vmem:[#allocation5 + $0x2e0] ss:$8 sps:$4 sm:$0xff]  }
  0xd8   :  { %845 = vmatpush1.bf16.msra.mxu0 %v2138_v29  ;;  %v2203_v29 = vld [vmem:[#allocation5 + $0x2f0] ss:$8 sps:$4 sm:$0xff]  }
  0xd9   :  { %846 = vmatprep.subr.bf16.mxu0 %v2143_v31  ;;  %v133_v31 = vld [vmem:[#allocation2 + $0x58] sm:$0xff] }
  0xda   :  { %v154_v34 = vpack.c.bf16 %v133_v31, %v126_v30 }
  0xdc   :  { %847 = vmatpush1.bf16.msra.mxu0 %v2141_v33  ;;  %v148_v33 = vld [vmem:[#allocation2 + $0xd0] sm:$0xff] }
  0xdd   :  { %848 = vmatprep.subr.bf16.mxu0 %v2146_v35  ;;  %v162_v35 = vpack.c.bf16 %v148_v33, %v141_v32  ;;  %v2259_v32 = vld [vmem:[#allocation8 + $0x50] sm:$0xff]  }
  0xe0   :  { %849 = vmatpush1.bf16.msra.mxu0 %v2144_v37  ;;  %v147_v37 = vld [vmem:[#allocation2 + $0xc8] sm:$0xff] }
  0xe1   :  { %850 = vmatprep.subr.bf16.mxu0 %v2149_v39  ;;  %v161_v38 = vpack.c.bf16 %v147_v37, %v140_v36  ;;  %v2248_v39 = vld [vmem:[#allocation7 + $0xd4] ss:$8 sps:$4 sm:$0xff]  }
  0xe2   :  { %1225 = vmatprep.subr.bf16.mxu1 %v2248_v39  ;;  %v2260_v37 = vld [vmem:[#allocation8 + $0x10] sm:$0xff]   ;;  %v2262_v39 = vld [vmem:[#allocation8 + $0x18] sm:$0xff]  }
  0xe3   :  { %1226 = vmatpush1.bf16.msra.mxu1 %v2246_v40  ;;  %v2263_v40 = vld [vmem:[#allocation8 + $0x60] sm:$0xff]  }
  0xe4   :  { %851 = vmatpush1.bf16.msra.mxu0 %v2147_v41  ;;  %v2251_v41 = vld [vmem:[#allocation7 + $0xe4] ss:$8 sps:$4 sm:$0xff]  }
  0xe5   :  { %852 = vmatprep.subr.bf16.mxu0 %v2152_v43  ;;  %1227 = vmatprep.subr.bf16.mxu1 %v2251_v41  ;;  %v2254_v43 = vld [vmem:[#allocation7 + $0xf4] ss:$8 sps:$4 sm:$0xff]   ;;  %v2264_v41 = vld [vmem:[#allocation8 + $0x20] sm:$0xff]  }
  0xe7   :  { %1228 = vmatpush1.bf16.msra.mxu1 %v2249_v42  ;;  %v2265_v42 = vld [vmem:[#allocation8 + $0x68] sm:$0xff]  }
  0xe8   :  { %853 = vmatpush1.bf16.msra.mxu0 %v2150_v45  ;;  %1229 = vmatprep.subr.bf16.mxu1 %v2254_v43  ;;  %v2266_v43 = vld [vmem:[#allocation8 + $0x28] sm:$0xff]  }
  0xe9   :  { %854 = vmatprep.subr.bf16.mxu0 %v2155_v47 }
  0xeb   :  { %1230 = vmatpush1.bf16.msra.mxu1 %v2252_v44  ;;  %v2267_v44 = vld [vmem:[#allocation8 + $0x70] sm:$0xff]  }
  0xec   :  { %855 = vmatpush1.bf16.msra.mxu0 %v2153_v49  ;;  %1926 = vmatprep.subr.bf16.mxu1 %v2255_v53 }
  0xed   :  { %877 = vmatprep.subr.bf16.mxu0 %v2158_v52 }
  0xef   :  { %857 = vmatmul.mubr.bf16.vlgmr.msra.gmra.mrb[0].mxu0 %v152_v55  ;;  %v2614_v55 = vshrl.u32 %v264_v54, 7 }
  0xf0   :  { %878 = vmatpush1.bf16.msra.mxu0 %v2156_v56  ;;  %866 = vmatprep.mubr.bf16.mxu0 %v160_v57  ;;  %v262_v57 = vld [vmem:[%s2658_s2] sm:$0x3] }
  0xf1   :  { %879 = vmatprep.subr.bf16.mxu0 %v2161_v58  ;;  %v266_v56 = vsub.s32 0, %v2614_v55  ;;  %v270_v58 = vsub.s32 1, %v2614_v55 }
  0xf3   :  { %v271_v60 = vrot.slane %v262_v57, %v270_v58 }
  0xf4   :  { %880 = vmatpush1.bf16.msra.mxu0 %v2159_v59  ;;  %v267_v59 = vrot.slane %v262_v57, %v266_v56 }
  0xf5   :  { %881 = vmatprep.subr.bf16.mxu0 %v2164_v62 }
  0xf7   :  { %867 = vmatmul.mubr.bf16.gmra.mrb[4].mxu0 %v159_v1 }
  0xf8   :  { %882 = vmatpush1.bf16.msra.mxu0 %v2162_v2  ;;  %909 = vmatprep.mubr.bf16.mxu0 %v155_v3 }
  0xf9   :  { %883 = vmatprep.subr.bf16.mxu0 %v2167_v4 }
  0xfc   :  { %884 = vmatpush1.bf16.msra.mxu0 %v2165_v5 }
  0xfd   :  { %885 = vmatprep.subr.bf16.mxu0 %v2170_v6 }
 0x100   :  { %886 = vmatpush1.bf16.msra.mxu0 %v2168_v7 }
 0x101   :  { %887 = vmatprep.subr.bf16.mxu0 %v2173_v8 }
 0x104   :  { %888 = vmatpush1.bf16.msra.mxu0 %v2171_v9 }
 0x105   :  { %889 = vmatprep.subr.bf16.mxu0 %v2176_v10 }
 0x108   :  { %890 = vmatpush1.bf16.msra.mxu0 %v2174_v11 }
 0x109   :  { %891 = vmatprep.subr.bf16.mxu0 %v2179_v12 }
 0x10c   :  { %892 = vmatpush1.bf16.msra.mxu0 %v2177_v13 }
 0x10d   :  { %893 = vmatprep.subr.bf16.mxu0 %v2182_v14 }
 0x110   :  { %894 = vmatpush1.bf16.msra.mxu0 %v2180_v15 }
 0x111   :  { %895 = vmatprep.subr.bf16.mxu0 %v2185_v16 }
 0x114   :  { %896 = vmatpush1.bf16.msra.mxu0 %v2183_v17 }
 0x115   :  { %897 = vmatprep.subr.bf16.mxu0 %v2188_v18 }
 0x118   :  { %898 = vmatpush1.bf16.msra.mxu0 %v2186_v19 }
 0x119   :  { %899 = vmatprep.subr.bf16.mxu0 %v2191_v20  ;;  %v2256_v20 = vld [vmem:[#allocation8] sm:$0xff]  }
 0x11c   :  { %900 = vmatpush1.bf16.msra.mxu0 %v2189_v21 }
 0x11d   :  { %901 = vmatprep.subr.bf16.mxu0 %v2194_v22 }
 0x120   :  { %902 = vmatpush1.bf16.msra.mxu0 %v2192_v23 }
 0x121   :  { %903 = vmatprep.subr.bf16.mxu0 %v2197_v24  ;;  %v2257_v24 = vld [vmem:[#allocation8 + $0x48] sm:$0xff]  }
 0x124   :  { %904 = vmatpush1.bf16.msra.mxu0 %v2195_v25 }
 0x125   :  { %905 = vmatprep.subr.bf16.mxu0 %v2200_v26 }
 0x128   :  { %906 = vmatpush1.bf16.msra.mxu0 %v2198_v27 }
 0x129   :  { %907 = vmatprep.subr.bf16.mxu0 %v2205_v28 }
 0x12c   :  { %908 = vmatpush1.bf16.msra.mxu0 %v2203_v29  ;;  %v2258_v29 = vld [vmem:[#allocation8 + $0x8] sm:$0xff]  }
 0x12f   :  { %910 = vmatmul.mubr.bf16.vlgmr.msra.gmra.mrb[0].mxu0 %v154_v34 }
 0x130   :  { %919 = vmatprep.mubr.bf16.mxu0 %v162_v35 }
 0x137   :  { %920 = vmatmul.mubr.bf16.gmra.mrb[4].mxu0 %v161_v38  ;;  %v2261_v38 = vld [vmem:[#allocation8 + $0x58] sm:$0xff]  }
 0x156   :  { %v964_v45 = vpop.f32.mrb[0].mxu1 }
 0x157   :  { %v966_v46 = vpop.f32.mrb[1].mxu1 }
 0x158   :  { %v968_v47 = vpop.f32.mrb[2].mxu1 }
 0x159   :  { %v970_v48 = vpop.f32.mrb[3].mxu1 }
 0x15e   :  { %v974_v49 = vpop.f32.mrb[4].mxu1 }
 0x15f   :  { %v976_v50 = vpop.f32.mrb[5].mxu1 }
 0x160   :  { %v978_v51 = vpop.f32.mrb[6].mxu1 }
 0x161   :  { %v980_v52 = vpop.f32.mrb[7].mxu1 }
 0x202   :  { %v911_v61 = vpop.f32.mrb[0].mxu0 }
 0x203   :  { %v2014_v62 = vadd.f32 %v911_v61, %v267_v59  ;;  %v913_v63 = vpop.f32.mrb[1].mxu0 }
 0x204   :  { %v2016_v0 = vadd.f32 %v913_v63, %v271_v60  ;;  %v915_v1 = vpop.f32.mrb[2].mxu0 }
 0x205   :  { %v2015_v2 = vadd.f32 %v2014_v62, %v964_v45  ;;  %v2018_v3 = vadd.f32 %v915_v1, %v267_v59  ;;  %v917_v4 = vpop.f32.mrb[3].mxu0  ;;  %v2268_v45 = vld [vmem:[#allocation8 + $0x30] sm:$0xff]  }
 0x206   :  { %v2017_v5 = vadd.f32 %v2016_v0, %v966_v46  ;;  %v2020_v6 = vadd.f32 %v917_v4, %v271_v60  ;;  %v2269_v46 = vld [vmem:[#allocation8 + $0x78] sm:$0xff]  }
 0x207   :  { %v2019_v7 = vadd.f32 %v2018_v3, %v968_v47  ;;  %v983_v9 = vmax.f32 %v2015_v2, 0.0  ;;  %v2270_v47 = vld [vmem:[#allocation8 + $0x38] sm:$0xff]  }
 0x208   :  { %v2021_v8 = vadd.f32 %v2020_v6, %v970_v48  ;;  %v984_v11 = vmax.f32 %v2017_v5, 0.0  ;;  %v2271_v48 = vld [vmem:[#allocation10] sm:$0xff]  }
 0x209   :  { %v985_v10 = vmax.f32 %v2019_v7, 0.0  ;;  %v2272_v7 = vld [vmem:[#allocation10 + $0x8] sm:$0xff]  }
 0x20a   :  { %v986_v12 = vmax.f32 %v2021_v8, 0.0  ;;  %v921_v13 = vpop.f32.mrb[4].mxu0 }
 0x20b   :  { %v991_v14 = vpack.c.bf16 %v985_v10, %v983_v9  ;;  %v2022_v15 = vadd.f32 %v921_v13, %v267_v59  ;;  %v923_v16 = vpop.f32.mrb[5].mxu0  ;;  %v2273_v13 = vld [vmem:[#allocation10 + $0x10] sm:$0xff]  }
 0x20c   :  { %v2024_v17 = vadd.f32 %v923_v16, %v271_v60  ;;  %v925_v18 = vpop.f32.mrb[6].mxu0  ;;  %v992_v19 = vpack.c.bf16 %v986_v12, %v984_v11 }
 0x20d   :  { %v2023_v21 = vadd.f32 %v2022_v15, %v974_v49  ;;  %v2026_v22 = vadd.f32 %v925_v18, %v267_v59  ;;  %v927_v23 = vpop.f32.mrb[7].mxu0  ;;  %v1027_v49 = vld [vmem:[%s2660_s4] sm:$0x3]  ;;  %v2274_v18 = vld [vmem:[#allocation10 + $0x18] sm:$0xff]  }
 0x20e   :  { %v2025_v25 = vadd.f32 %v2024_v17, %v976_v50  ;;  %v2028_v26 = vadd.f32 %v927_v23, %v271_v60  ;;  %1231 = vmatprep.mubr.bf16.mxu1 %v992_v19  ;;  %v1032_v50 = vrot.slane %v1027_v49, %v266_v56  ;;  %v2275_v19 = vld [vmem:[#allocation10 + $0x20] sm:$0xff]  }
 0x20f   :  { %v2027_v27 = vadd.f32 %v2026_v22, %v978_v51  ;;  %1232 = vmatmul.mubr.bf16.vlgmr.msra.gmra.mrb[8].mxu1 %v991_v14  ;;  %v987_v30 = vmax.f32 %v2023_v21, 0.0  ;;  %v1036_v51 = vrot.slane %v1027_v49, %v270_v58  ;;  %v2277_v21 = vld [vmem:[#allocation10 + $0x30] sm:$0xff]   ;;  %v2278_v22 = vld [vmem:[#allocation10 + $0x38] sm:$0xff]   ;;  %v2279_v23 = vld [vmem:[#allocation11] sm:$0xff]  }
 0x210   :  { %v2029_v28 = vadd.f32 %v2028_v26, %v980_v52  ;;  %1927 = vmatpush3.bf16.msra.mxu1 %v2256_v20  ;;  %v988_v33 = vmax.f32 %v2025_v25, 0.0  ;;  %v2276_v20 = vld [vmem:[#allocation10 + $0x28] sm:$0xff]   ;;  %v1872_v25 = vld [vmem:[%s2662_s6] ss:$0 sm:$0xff]  ;;  %v2282_v49 = vld [vmem:[#allocation11 + $0x18] sm:$0xff]  }
 0x211   :  { %v989_v31 = vmax.f32 %v2027_v27, 0.0  ;;  %1928 = vmatprep.subr.bf16.mxu1 %v2257_v24 }
 0x212   :  { %v990_v34 = vmax.f32 %v2029_v28, 0.0 }
 0x213   :  { %v993_v35 = vpack.c.bf16 %v989_v31, %v987_v30 }
 0x214   :  { %v994_v36 = vpack.c.bf16 %v990_v34, %v988_v33  ;;  %1929 = vmatpush3.bf16.msra.mxu1 %v2258_v29 }
 0x215   :  { %1930 = vmatprep.subr.bf16.mxu1 %v2259_v32 }
 0x216   :  { %1241 = vmatprep.mubr.bf16.mxu1 %v994_v36 }
 0x217   :  { %1242 = vmatmul.mubr.bf16.gmra.mrb[12].mxu1 %v993_v35 }
 0x218   :  { %1931 = vmatpush3.bf16.msra.mxu1 %v2260_v37 }
 0x219   :  { %1932 = vmatprep.subr.bf16.mxu1 %v2261_v38 }
 0x21c   :  { %1933 = vmatpush3.bf16.msra.mxu1 %v2262_v39 }
 0x21d   :  { %1934 = vmatprep.subr.bf16.mxu1 %v2263_v40 }
 0x220   :  { %1935 = vmatpush3.bf16.msra.mxu1 %v2264_v41 }
 0x221   :  { %1936 = vmatprep.subr.bf16.mxu1 %v2265_v42 }
 0x224   :  { %1937 = vmatpush3.bf16.msra.mxu1 %v2266_v43 }
 0x225   :  { %1938 = vmatprep.subr.bf16.mxu1 %v2267_v44 }
 0x228   :  { %1939 = vmatpush3.bf16.msra.mxu1 %v2268_v45 }
 0x229   :  { %1940 = vmatprep.subr.bf16.mxu1 %v2269_v46 }
 0x22c   :  { %1941 = vmatpush3.bf16.msra.mxu1 %v2270_v47  ;;  %v2280_v47 = vld [vmem:[#allocation11 + $0x8] sm:$0xff]  }
 0x22d   :  { %1974 = vmatprep.subr.bf16.mxu1 %v2271_v48 }
 0x2e2   :  { %v1233_v52 = vpop.f32.mrb[8].mxu1 }
 0x2e3   :  { %v1234_v53 = vadd.f32 %v1233_v52, %v1032_v50  ;;  %v1235_v54 = vpop.f32.mrb[9].mxu1  ;;  %v2285_v52 = vld [vmem:[#allocation11 + $0x30] sm:$0xff]  }
 0x2e4   :  { %v1236_v57 = vadd.f32 %v1235_v54, %v1036_v51  ;;  %v1237_v59 = vpop.f32.mrb[10].mxu1  ;;  %v1889_v54 = vld [vmem:[%s2664_s8] ss:$0 sm:$0xff]  ;;  %s2464_s8 = smov [#allocation13]  }
 0x2e5   :  { %v1238_v60 = vadd.f32 %v1237_v59, %v1032_v50  ;;  %v1239_v61 = vpop.f32.mrb[11].mxu1  ;;  %v1252_v63 = vmax.f32 %v1234_v53, 0.0  ;;  %v2286_v53 = vld [vmem:[#allocation11 + $0x38] sm:$0xff]   ;;  %s1725_s29 = sshll.u32 %s2464_s8, 4  ;;  %s1726_s29 = int_to_ptr.vmem [resolvable:$true] %s1725_s29 }
 0x2e6   :  { %v1240_v62 = vadd.f32 %v1239_v61, %v1036_v51  ;;  %v1253_v1 = vmax.f32 %v1236_v57, 0.0  ;;  %s2419_s30 = scalar_lea.vmem %s1726_s29, 256  ;;  %p2424_p7 = scmp.lt.s32.totalorder %s1726_s29, %s1726_s29 }
 0x2e7   :  { %v1254_v0 = vmax.f32 %v1238_v60, 0.0  ;;  %p2420_p6 = scmp.ne.s32.totalorder %s1726_s29, %s2419_s30  ;;  %p2425_p8 = scmp.lt.s32.totalorder %s2419_s30, %s2419_s30 }
 0x2e8   :  { %v1255_v2 = vmax.f32 %v1240_v62, 0.0 }
 0x2e9   :  { %v1260_v3 = vpack.c.bf16 %v1254_v0, %v1252_v63  ;;  %p2426_p9 = por %p2425_p8, %p2424_p7 }
 0x2ea   :  { %v1261_v4 = vpack.c.bf16 %v1255_v2, %v1253_v1  ;;  %v1243_v5 = vpop.f32.mrb[12].mxu1 }
 0x2eb   :  { %v1244_v6 = vadd.f32 %v1243_v5, %v1032_v50  ;;  %v1245_v56 = vpop.f32.mrb[13].mxu1  ;;  %p2427_p10 = pnand %p2426_p9, %p2420_p6 }
 0x2ec   :  { %v1246_v55 = vadd.f32 %v1245_v56, %v1036_v51  ;;  %v1247_v58 = vpop.f32.mrb[14].mxu1  ;;  %1431 = vmatprep.mubr.bf16.mxu1 %v1261_v4 }
 0x2ed   :  { %v1248_v8 = vadd.f32 %v1247_v58, %v1032_v50  ;;  %v1249_v9 = vpop.f32.mrb[15].mxu1  ;;  %1432 = vmatmul.mubr.bf16.vlgmr.msra.gmra.mrb[16].mxu1 %v1260_v3  ;;  %v1256_v11 = vmax.f32 %v1244_v6, 0.0  ;;  %v2283_v50 = vld [vmem:[#allocation11 + $0x20] sm:$0xff]  }
 0x2ee   :  { %v1250_v10 = vadd.f32 %v1249_v9, %v1036_v51  ;;  %1975 = vmatpush3.bf16.msra.mxu1 %v2271_v48  ;;  %v1257_v14 = vmax.f32 %v1246_v55, 0.0  ;;  %v2281_v48 = vld [vmem:[#allocation11 + $0x10] sm:$0xff]   ;;  %v2284_v51 = vld [vmem:[#allocation11 + $0x28] sm:$0xff]  }
 0x2ef   :  { %v1258_v12 = vmax.f32 %v1248_v8, 0.0  ;;  %1976 = vmatprep.subr.bf16.mxu1 %v2272_v7  ;;  %v1898_v55 = vld [vmem:[%s2666_s10] ss:$0 sm:$0xff] }
 0x2f0   :  { %v1259_v15 = vmax.f32 %v1250_v10, 0.0 }
 0x2f1   :  { %v1262_v16 = vpack.c.bf16 %v1258_v12, %v1256_v11 }
 0x2f2   :  { %v1263_v17 = vpack.c.bf16 %v1259_v15, %v1257_v14  ;;  %1977 = vmatpush3.bf16.msra.mxu1 %v2272_v7 }
 0x2f3   :  { %1978 = vmatprep.subr.bf16.mxu1 %v2273_v13 }
 0x2f4   :  { %1439 = vmatprep.mubr.bf16.mxu1 %v1263_v17 }
 0x2f5   :  { %1440 = vmatmul.mubr.bf16.gmra.mrb[20].mxu1 %v1262_v16 }
 0x2f6   :  { %1979 = vmatpush3.bf16.msra.mxu1 %v2273_v13 }
 0x2f7   :  { %1980 = vmatprep.subr.bf16.mxu1 %v2274_v18 }
 0x2fa   :  { %1981 = vmatpush3.bf16.msra.mxu1 %v2274_v18 }
 0x2fb   :  { %1982 = vmatprep.subr.bf16.mxu1 %v2275_v19 }
 0x2fe   :  { %1983 = vmatpush3.bf16.msra.mxu1 %v2275_v19 }
 0x2ff   :  { %1984 = vmatprep.subr.bf16.mxu1 %v2276_v20 }
 0x302   :  { %1985 = vmatpush3.bf16.msra.mxu1 %v2276_v20 }
 0x303   :  { %1986 = vmatprep.subr.bf16.mxu1 %v2277_v21 }
 0x306   :  { %1987 = vmatpush3.bf16.msra.mxu1 %v2277_v21 }
 0x307   :  { %1988 = vmatprep.subr.bf16.mxu1 %v2278_v22 }
 0x30a   :  { %1989 = vmatpush3.bf16.msra.mxu1 %v2278_v22 }
 0x30b   :  { %1994 = vmatprep.subr.bf16.mxu1 %v2279_v23 }
 0x3c0   :  { %v1942_v24 = vpop.f32.mrb[16].mxu1 }
 0x3c1   :  { %v1943_v26 = vpop.f32.mrb[17].mxu1 }
 0x3c2   :  { %v1944_v27 = vadd.f32 %v1943_v26, %v1942_v24  ;;  %v1945_v28 = vpop.f32.mrb[18].mxu1 }
 0x3c3   :  { %v1946_v29 = vpop.f32.mrb[19].mxu1 }
 0x3c4   :  { %v1434_v30 = vadd.f32 %v1944_v27, %v1872_v25  ;;  %v1947_v31 = vadd.f32 %v1946_v29, %v1945_v28 }
 0x3c6   :  { %v1437_v32 = vadd.f32 %v1947_v31, %v1872_v25  ;;  %v1448_v33 = vmax.f32 %v1434_v30, 0.0 }
 0x3c8   :  { %v1449_v34 = vmax.f32 %v1437_v32, 0.0  ;;  %v1948_v35 = vpop.f32.mrb[20].mxu1 }
 0x3c9   :  { %v1949_v36 = vpop.f32.mrb[21].mxu1 }
 0x3ca   :  { %v1950_v37 = vadd.f32 %v1949_v36, %v1948_v35  ;;  %v1951_v38 = vpop.f32.mrb[22].mxu1  ;;  %v1452_v39 = vpack.c.bf16 %v1449_v34, %v1448_v33 }
 0x3cb   :  { %v1952_v40 = vpop.f32.mrb[23].mxu1 }
 0x3cc   :  { %v1442_v41 = vadd.f32 %v1950_v37, %v1872_v25  ;;  %v1953_v42 = vadd.f32 %v1952_v40, %v1951_v38  ;;  %1990 = vmatprep.mubr.bf16.mxu1 %v1452_v39 }
 0x3ce   :  { %v1445_v43 = vadd.f32 %v1953_v42, %v1872_v25  ;;  %v1450_v44 = vmax.f32 %v1442_v41, 0.0 }
 0x3d0   :  { %v1451_v45 = vmax.f32 %v1445_v43, 0.0 }
 0x3d2   :  { %v1453_v46 = vpack.c.bf16 %v1451_v45, %v1450_v44 }
 0x3d4   :  { %1991 = vmatmul.mubr.bf16.vlgmr.msra.gmra.mrb[24].mxu1 %v1453_v46 }
 0x3d5   :  { %1995 = vmatpush3.bf16.msra.mxu1 %v2279_v23 }
 0x3d6   :  { %1996 = vmatprep.subr.bf16.mxu1 %v2280_v47 }
 0x3d9   :  { %1997 = vmatpush3.bf16.msra.mxu1 %v2280_v47 }
 0x3da   :  { %1998 = vmatprep.subr.bf16.mxu1 %v2281_v48 }
 0x3dd   :  { %1999 = vmatpush3.bf16.msra.mxu1 %v2281_v48 }
 0x3de   :  { %2000 = vmatprep.subr.bf16.mxu1 %v2282_v49 }
 0x3e1   :  { %2001 = vmatpush3.bf16.msra.mxu1 %v2282_v49 }
 0x3e2   :  { %2002 = vmatprep.subr.bf16.mxu1 %v2283_v50 }
 0x3e5   :  { %2003 = vmatpush3.bf16.msra.mxu1 %v2283_v50 }
 0x3e6   :  { %2004 = vmatprep.subr.bf16.mxu1 %v2284_v51 }
 0x3e9   :  { %2005 = vmatpush3.bf16.msra.mxu1 %v2284_v51 }
 0x3ea   :  { %2006 = vmatprep.subr.bf16.mxu1 %v2285_v52 }
 0x3ed   :  { %2007 = vmatpush3.bf16.msra.mxu1 %v2285_v52 }
 0x3ee   :  { %2008 = vmatprep.subr.bf16.mxu1 %v2286_v53 }
 0x3f1   :  { %2009 = vmatpush3.bf16.msra.mxu1 %v2286_v53 }
 0x4a7   :  { %v1992_v57 = vpop.f32.mrb[24].mxu1 }
 0x4a8   :  { %v1568_v59 = vadd.f32 %v1992_v57, %v1889_v54  ;;  %v1559_v60 = vpop.f32.mrb[25].mxu1 }
 0x4a9   :  { %v1560_v61 = vadd.f32 %v1889_v54, %v1559_v60  ;;  %v1993_v62 = vpop.f32.mrb[26].mxu1 }
 0x4aa   :  { %v1571_v63 = vadd.f32 %v1993_v62, %v1889_v54  ;;  %v1562_v0 = vpop.f32.mrb[27].mxu1  ;;  %v1576_v2 = vmax.f32 %v1568_v59, 0.0 }
 0x4ab   :  { %v1563_v1 = vadd.f32 %v1889_v54, %v1562_v0  ;;  %v1574_v4 = vmax.f32 %v1560_v61, 0.0 }
 0x4ac   :  { %v1577_v3 = vmax.f32 %v1571_v63, 0.0 }
 0x4ad   :  { %v1575_v5 = vmax.f32 %v1563_v1, 0.0 }
 0x4ae   :  { %v1579_v6 = vpack.c.bf16 %v1577_v3, %v1576_v2 }
 0x4af   :  { %v1578_v56 = vpack.c.bf16 %v1575_v5, %v1574_v4 }
 0x4b1   :  { %2010 = vmatprep.mubr.bf16.mxu1 %v1578_v56 }
 0x4b2   :  { %2011 = vmatmul.mubr.bf16.vlgmr.msra.gmra.mrb[28].mxu1 %v1579_v6 }
 0x585   :  { %v2012_v7 = vpop.f32.mrb[28].mxu1 }
 0x586   :  { %v1685_v58 = vpop.f32.mrb[29].mxu1  ;;  %v1694_v9 = vadd.f32 %v2012_v7, %v1898_v55 }
 0x587   :  { %v2013_v8 = vpop.f32.mrb[30].mxu1  ;;  %v1686_v12 = vadd.f32 %v1898_v55, %v1685_v58 }
 0x588   :  { %v1697_v10 = vadd.f32 %v2013_v8, %v1898_v55  ;;  %v1688_v11 = vpop.f32.mrb[31].mxu1 }
 0x589   :  { %v1689_v13 = vadd.f32 %v1898_v55, %v1688_v11 }
 0x58a   :  { %v1923_v14 = vpack.c.bf16 %v1697_v10, %v1694_v9 }
 0x58b   :  { %v1918_v15 = vpack.c.bf16 %v1689_v13, %v1686_v12 }
 0x58c   :  { %1925 = vst [vmem:[#allocation13 + $0x8] sm:$0xff] %v1923_v14  }
 0x58d   :  { %1919 = vst [vmem:[#allocation13] sm:$0xff] %v1918_v15  }
 0x58e   :  { %2430 = shalt.err (!%p2427_p10)
}
 0x58f   :  { %s2431_s27 = scalar_lea.hbm %s2667_s11, 256 }
 0x590   :  { %p2432_p11 = scmp.ne.s32.totalorder %s2667_s11, %s2431_s27  ;;  %p2435_p12 = scmp.lt.u32.totalorder %s2431_s27, %s2667_s11 }
 0x592   :  { %p2437_p13 = pnand %p2435_p12, %p2432_p11 }
 0x594   :  { %2440 = shalt.err (!%p2437_p13)
}
 0x595   :  { %1731 = dma.vmem_to_hbm [thread:$0]  %s1726_s29, 256, %s2667_s11, [#allocation4], %s2455_s1, %s2455_s1, %s2456_s18  }
 0x596   :  { %2449 = dma.done.wait [#allocation4], 256  }
 0x597   :  { %2450 = vsyncadd [#allocation4], 4294967040 }
 0x598   :  { %1735 = vsyncpa [#allocation3], 1 }
 0x599   :  { %1736 = vsyncpa [#allocation6], 1 }
 0x59a   :  { %1737 = vsyncpa [#allocation9], 1 }
 0x59b   :  { %1738 = vsyncpa [#allocation12], 1 }
 0x59c   :  { %1739 = vsyncpa [#allocation4], 1 }

</bundles_post_ra>
